<compile_context>
chip_gen: v5e
topology: v5e:2x2
jax: 0.10.0
libtpu: 0.0.40
codegen_flags: <defaults>
</compile_context>

<pallas_src>
import numpy as np
import jax
import jax.numpy as jnp
from jax.experimental import pallas as pl
from jax.experimental.pallas import tpu as pltpu


# --------------------------------------------------------------------------------------
# Kernel bodies
# --------------------------------------------------------------------------------------
def _make_kernel(C, use_vpu):
    """Kernel computes out_tile = W @ x_tile with W:(C,C), x_tile:(C, tile)."""
    if use_vpu:
        # Small C: sum of broadcast multiplies on the VPU (MXU would be <5% utilized).
        def kernel(w_ref, x_ref, o_ref):
            w = w_ref[...]                      # (C, C)
            x = x_ref[...]                      # (C, tile)
            acc = w[:, 0:1] * x[0:1, :]         # (C,1)*(1,tile) -> (C, tile)
            for c in range(1, C):
                acc = acc + w[:, c:c + 1] * x[c:c + 1, :]
            o_ref[...] = acc.astype(o_ref.dtype)
    else:
        # Larger C: hot-path matmul on the MXU.
        def kernel(w_ref, x_ref, o_ref):
            o_ref[...] = jnp.dot(
                w_ref[...], x_ref[...],
                preferred_element_type=jnp.float32).astype(o_ref.dtype)
    return kernel


# --------------------------------------------------------------------------------------
# Weight reconstruction (hoisted out of the kernel, done once per call in XLA)
# --------------------------------------------------------------------------------------
def calc_weight(p):
    l_mat = p["w_l"] * p["l_mask"] + p["l_eye"]
    s = p["s_sign"] * jnp.exp(p["w_s"]) + 1e-5
    u_mat = p["w_u"] * p["u_mask"] + jnp.diag(s)
    return (p["w_p"] @ l_mat @ u_mat).astype(jnp.float32)       # (C_out, C_in)


# --------------------------------------------------------------------------------------
# Public forward
# --------------------------------------------------------------------------------------
def inv_conv2d_lu(x, params, *, tile=1024):
    """x: (N, C, H, W) float32. Returns F.conv2d(x, calc_weight()[:, :, None, None])."""
    N, C, H, Wd = x.shape
    hw = H * Wd

    w = calc_weight(params)                                      # (C, C), once

    # --- lane tiling: tile must be a multiple of 128 (or equal the full lane extent) ---
    tile = max(128, (int(tile) // 128) * 128)
    hw_128 = -(-hw // 128) * 128            # hw rounded up to a multiple of 128
    tile_eff = min(tile, hw_128)
    hw_pad = -(-hw // tile_eff) * tile_eff  # pad so the grid covers hw exactly

    # Free view: NCHW -> (N, C, H*W). No transpose, no extra HBM round trip.
    x3 = x.reshape(N, C, hw)
    if hw_pad != hw:
        x3 = jnp.pad(x3, ((0, 0), (0, 0), (0, hw_pad - hw)))

    num_tiles = hw_pad // tile_eff
    kernel = _make_kernel(C, use_vpu=(C <= 16))

    cost = pl.CostEstimate(
        flops=2 * C * C * N * hw_pad,
        transcendentals=0,
        bytes_accessed=(2 * C * N * hw_pad + C * C) * 4,
    )

    out3 = pl.pallas_call(
        kernel,
        out_shape=jax.ShapeDtypeStruct((N, C, hw_pad), x.dtype),
        grid_spec=pltpu.PrefetchScalarGridSpec(
            num_scalar_prefetch=0,
            grid=(N, num_tiles),
            in_specs=[
                # W is grid-invariant: same block index every step -> stays resident.
                pl.BlockSpec((C, C), lambda n, i: (0, 0)),
                # x tile: (C, tile_eff) slab for image n, pixel-tile i.
                pl.BlockSpec((None, C, tile_eff), lambda n, i: (n, 0, i)),
            ],
            out_specs=pl.BlockSpec((None, C, tile_eff), lambda n, i: (n, 0, i)),
        ),
        compiler_params=pltpu.CompilerParams(
            dimension_semantics=("parallel", "parallel"),
            vmem_limit_bytes=48 * 1024 * 1024,   # headroom even on v7x's 64 MiB VMEM
        ),
        cost_estimate=cost,
    )(w, x3)

    if hw_pad != hw:
        out3 = out3[:, :, :hw]
    return out3.reshape(N, C, H, Wd)             # free view back to NCHW


# --------------------------------------------------------------------------------------
# Parameter init (re-implementation of InvConv2dLU.__init__: QR + LU of a random matrix)
# --------------------------------------------------------------------------------------
def init_params(key, in_channel):
    C = in_channel
    w0 = jax.random.normal(key, (C, C), dtype=jnp.float32)
    q, _ = jnp.linalg.qr(w0)
    q = q.astype(jnp.float32)
    # scipy.linalg.lu(q) -> p, l, u  with  q = p @ l @ u
    w_p, w_l, w_u_full = jax.scipy.linalg.lu(q)
    w_s = jnp.diag(w_u_full)
    w_u = jnp.triu(w_u_full, 1)
    u_mask = jnp.triu(jnp.ones((C, C), jnp.float32), 1)
    l_mask = u_mask.T
    return {
        "w_p": w_p.astype(jnp.float32),
        "w_l": w_l.astype(jnp.float32),
        "w_u": w_u.astype(jnp.float32),
        "w_s": jnp.log(jnp.abs(w_s)).astype(jnp.float32),   # trainable log|s|
        "s_sign": jnp.sign(w_s).astype(jnp.float32),
        "l_mask": l_mask,
        "u_mask": u_mask,
        "l_eye": jnp.eye(C, dtype=jnp.float32),
    }


def reference_forward(x, p):
    """Plain-JAX reference matching the PyTorch forward (for sanity checking)."""
    l_mat = p["w_l"] * p["l_mask"] + p["l_eye"]
    u_mat = p["w_u"] * p["u_mask"] + jnp.diag(p["s_sign"] * jnp.exp(p["w_s"]) + 1e-5)
    w = p["w_p"] @ l_mat @ u_mat
    return jnp.einsum("oc,nchw->nohw", w, x)     # 1x1 conv in NCHW


if __name__ == "__main__":
    key = jax.random.PRNGKey(0)
    k_param, k_x = jax.random.split(key)

    N, C, H, W = 2, 4, 16, 16
    params = init_params(k_param, C)
    x = jax.random.normal(k_x, (N, C, H, W), dtype=jnp.float32)

    out = inv_conv2d_lu(x, params)
    out = jax.block_until_ready(out)

    ref = reference_forward(x, params)
    assert out.shape == (N, C, H, W)
    np.testing.assert_allclose(np.asarray(out), np.asarray(ref), rtol=1e-5, atol=1e-5)

    print("KERNEL_OK")
</pallas_src>

<mosaic_0001>
module attributes {stable_mosaic.version = 11 : i64} {
  func.func @kernel(%arg0: i32, %arg1: i32, %arg2: memref<4x4xf32, #tpu.memory_space<vmem>>, %arg3: memref<1x4x256xf32, #tpu.memory_space<vmem>>, %arg4: memref<1x4x256xf32, #tpu.memory_space<vmem>>) attributes {dimension_semantics = [#tpu.dimension_semantics<parallel>, #tpu.dimension_semantics<parallel>], iteration_bounds = array<i64: 2, 1>, scalar_prefetch = 0 : i64, scratch_operands = 0 : i64, tpu.core_type = #tpu.core_type<tc>, window_params = [{pipeline_mode = #tpu.pipeline_mode<synchronous>, transform_indices = @transform_0, window_bounds = array<i64: 4, 4>}, {transform_indices = @transform_1, window_bounds = array<i64: 1, 4, 256>}, {transform_indices = @transform_2, window_bounds = array<i64: 1, 4, 256>}]} {
    %c0 = arith.constant 0 : index
    %c0_0 = arith.constant 0 : index
    %0 = vector.load %arg2[%c0, %c0_0] : memref<4x4xf32, #tpu.memory_space<vmem>>, vector<4x4xf32>
    %c0_1 = arith.constant 0 : index
    %c0_2 = arith.constant 0 : index
    %c0_3 = arith.constant 0 : index
    %1 = vector.load %arg3[%c0_1, %c0_2, %c0_3] : memref<1x4x256xf32, #tpu.memory_space<vmem>>, vector<1x4x256xf32>
    %2 = vector.shape_cast %1 : vector<1x4x256xf32> to vector<4x256xf32>
    %3 = vector.extract_strided_slice %0 {offsets = [0, 0], sizes = [4, 1], strides = [1, 1]} : vector<4x4xf32> to vector<4x1xf32>
    %4 = vector.extract_strided_slice %2 {offsets = [0, 0], sizes = [1, 256], strides = [1, 1]} : vector<4x256xf32> to vector<1x256xf32>
    %5 = vector.broadcast %3 : vector<4x1xf32> to vector<4x256xf32>
    %6 = vector.broadcast %4 : vector<1x256xf32> to vector<4x256xf32>
    %7 = arith.mulf %5, %6 : vector<4x256xf32>
    %8 = vector.extract_strided_slice %0 {offsets = [0, 1], sizes = [4, 1], strides = [1, 1]} : vector<4x4xf32> to vector<4x1xf32>
    %9 = vector.extract_strided_slice %2 {offsets = [1, 0], sizes = [1, 256], strides = [1, 1]} : vector<4x256xf32> to vector<1x256xf32>
    %10 = vector.broadcast %8 : vector<4x1xf32> to vector<4x256xf32>
    %11 = vector.broadcast %9 : vector<1x256xf32> to vector<4x256xf32>
    %12 = arith.mulf %10, %11 : vector<4x256xf32>
    %13 = arith.addf %7, %12 : vector<4x256xf32>
    %14 = vector.extract_strided_slice %0 {offsets = [0, 2], sizes = [4, 1], strides = [1, 1]} : vector<4x4xf32> to vector<4x1xf32>
    %15 = vector.extract_strided_slice %2 {offsets = [2, 0], sizes = [1, 256], strides = [1, 1]} : vector<4x256xf32> to vector<1x256xf32>
    %16 = vector.broadcast %14 : vector<4x1xf32> to vector<4x256xf32>
    %17 = vector.broadcast %15 : vector<1x256xf32> to vector<4x256xf32>
    %18 = arith.mulf %16, %17 : vector<4x256xf32>
    %19 = arith.addf %13, %18 : vector<4x256xf32>
    %20 = vector.extract_strided_slice %0 {offsets = [0, 3], sizes = [4, 1], strides = [1, 1]} : vector<4x4xf32> to vector<4x1xf32>
    %21 = vector.extract_strided_slice %2 {offsets = [3, 0], sizes = [1, 256], strides = [1, 1]} : vector<4x256xf32> to vector<1x256xf32>
    %22 = vector.broadcast %20 : vector<4x1xf32> to vector<4x256xf32>
    %23 = vector.broadcast %21 : vector<1x256xf32> to vector<4x256xf32>
    %24 = arith.mulf %22, %23 : vector<4x256xf32>
    %25 = arith.addf %19, %24 : vector<4x256xf32>
    %c0_4 = arith.constant 0 : index
    %c0_5 = arith.constant 0 : index
    %c0_6 = arith.constant 0 : index
    %26 = vector.load %arg4[%c0_4, %c0_5, %c0_6] : memref<1x4x256xf32, #tpu.memory_space<vmem>>, vector<1x4x256xf32>
    %27 = vector.shape_cast %26 : vector<1x4x256xf32> to vector<4x256xf32>
    %28 = vector.shape_cast %25 : vector<4x256xf32> to vector<1x4x256xf32>
    tpu.vector_store %arg4[%c0_4, %c0_5, %c0_6], %28 {strides = array<i32>} : memref<1x4x256xf32, #tpu.memory_space<vmem>>, vector<1x4x256xf32>,
    return
  }
  func.func @transform_0(%arg0: i32, %arg1: i32) -> (i32, i32) {
    %c0_i32 = arith.constant 0 : i32
    %c0_i32_0 = arith.constant 0 : i32
    %c0_i32_1 = arith.constant 0 : i32
    return %c0_i32, %c0_i32_0 : i32, i32
  }
  func.func @transform_1(%arg0: i32, %arg1: i32) -> (i32, i32, i32) {
    %c0_i32 = arith.constant 0 : i32
    %c0_i32_0 = arith.constant 0 : i32
    return %arg0, %c0_i32, %arg1 : i32, i32, i32
  }
  func.func @transform_2(%arg0: i32, %arg1: i32) -> (i32, i32, i32) {
    %c0_i32 = arith.constant 0 : i32
    %c0_i32_0 = arith.constant 0 : i32
    return %arg0, %c0_i32, %arg1 : i32, i32, i32
  }
}

</mosaic_0001>

<bundles_post_ra>
// kernel: tpu_custom_call.1
= control target key start
LH: loop header
LB: loop body
LE: loop exit
PB: predicated region body
PF: predicated region fallthrough
CT: control target
= control target key end

     0   :  { %7 = vsyncpa [#allocation3], 0  ;;  %s799_s0 = inlined_call_operand.hbm [shape: f32[4,4], index: 0, kind: input, shape index: {}]   ;;  %s800_s1 = inlined_call_operand.hbm [shape: f32[2,4,256], index: 1, kind: input, shape index: {}]   ;;  %s801_s2 = inlined_call_operand.hbm [shape: f32[2,4,256], index: 2, kind: output, shape index: {}]  }
   0x1   :  { %8 = vsyncpa [#allocation6], 0 }
   0x2   :  { %10 = vsyncpa [#allocation6 + $0x1], 0 }
   0x3   :  { %11 = vsyncpa [#allocation4], 0 }
   0x4   :  { %13 = vsyncpa [#allocation4 + $0x1], 0  ;;  %s646_s9 = smov 0   ;;  %s648_s10 = smov 0  }
   0x5   :  { %s650_s11 = smov 0   ;;  %s652_s12 = smov 0  }
   0x6   :  { %s654_s13 = smov 0   ;;  %s656_s14 = smov 0  }
   0x7 LB: > { %s377_s15 = sadd.s32 4294967295, %s624_s14   ;;  %s378_s16 = sadd.s32 4294967294, %s624_s14   ;;  %s624_s14 = sphi %s656_s14, %s19_s14   ;;  %s620_s13 = sphi %s654_s13, %s813_s13   ;;  %s616_s12 = sphi %s652_s12, %s812_s12   ;;  %s612_s11 = sphi %s650_s11, %s811_s11   ;;  %s608_s10 = sphi %s648_s10, %s810_s10   ;;  %s604_s9 = sphi %s646_s9, %s809_s9  }
   0x8   : > { %p74_p0 = scmp.ne.s32.totalorder %s608_s10, %s604_s9  ;;  %p680_p1 = scmp.eq.s32.totalorder %s377_s15, 0 }
   0x9   : > { %p684_p2 = scmp.eq.s32.totalorder %s377_s15, 1  ;;  %p106_p3 = scmp.eq.s32.totalorder %s378_s16, 1 }
   0xa   : > { %p690_p4 = por %p680_p1, %p74_p0  ;;  %p379_p5 = scmp.ge.s32.totalorder %s624_s14, 1 }
   0xb   : > { %p695_p6 = por %p106_p3, %p74_p0  ;;  %p113_p7 = scmp.lt.s32.totalorder %s624_s14, 3 }
   0xc   : > { %s125_s23 = sshll.u32 %s799_s0, 4  ;;  %p381_p9 = scmp.ge.s32.totalorder %s624_s14, 2  ;;  %s126_s23 = int_to_ptr.hbm [resolvable:$true] %s125_s23 }
   0xd   : > { %p703_p8 = pnand %p379_p5, %p113_p7  ;;  %s626_s25 = smov [#allocation2]  }
   0xe   : > { %s127_s26 = sshll.u32 %s626_s25, 4  ;;  %s31_s27 = sadd.s32 1, %s620_s13  ;;  %s128_s26 = int_to_ptr.vmem [resolvable:$true] %s127_s26 }
   0xf   : > { %p404_p10 = pneg %p703_p8  ;;  %p33_p12 = scmp.ge.s32.totalorder %s31_s27, 2 }
  0x10   : > { %s61_s28 = sadd.s32 1, %s612_s11  ;;  %p68_p13 = scmp.ne.s32.totalorder %s612_s11, %s608_s10 }
  0x11   : > { %p405_p11 = pnand %p404_p10, %p680_p1  ;;  %p69_p0 = scmp.eq.s32.totalorder %s624_s14, 0 }
  0x12   : > { %s815_s27 = smov (%p33_p12, %s31_s27), 0  ;;  %p725_p5 = por %p684_p2, %p68_p13 }
  0x13   : > { %407 = dma.hbm_to_vmem [thread:$0]  (!%p405_p11), %s126_s23, 64, %s128_s26, [#allocation3]  }
  0x14   : > { %p719_p3 = por %p69_p0, %p68_p13  ;;  %s56_s3 = ssub.s32 %s620_s13, %s815_s27 }
  0x15   : > { %p417_p7 = scmp.lt.s32.totalorder %s624_s14, 2  ;;  %p59_p10 = scmp.eq.s32.totalorder %s56_s3, 0 }
  0x16   : > { %s138_s4 = sand.u32 1, %s612_s11   ;;  %s394_s7 = sshll.u32 %s620_s13, 3 }
  0x17   : > { %s382_s5 = sshll.u32 %s138_s4, 3  ;;  %s149_s16 = scalar_lea.hbm %s800_s1, %s394_s7 }
  0x18   : > { %s734_s6 = scalar_select %p59_p10, %s612_s11, %s61_s28  }
  0x19   : > { %s142_s21 = scalar_lea.vmem [#allocation5], %s382_s5  ;;  %s151_s18 = sshll.u32 %s149_s16, 4  ;;  %s152_s18 = int_to_ptr.hbm [resolvable:$true] %s151_s18 }
  0x1a   : > { %s153_s22 = sshll.u32 %s142_s21, 4  ;;  %p409_p2 = pnand %p417_p7, %p719_p3  ;;  %s154_s22 = int_to_ptr.vmem [resolvable:$true] %s153_s22 }
  0x1b   : > { %s139_s23 = scalar_lea.sflag [#allocation6], %s138_s4  ;;  %162 = sbr.rel (%p703_p8) target bundleno = 177 (0xb1), region = 28 }
  0x1c   : > { %411 = dma.hbm_to_vmem [thread:$0]  (!%p409_p2), %s152_s18, 128, %s154_s22, %s139_s23  }
  0x20   : > { %591 = dma.done.wait (%p680_p1), [#allocation3], 64  }
  0x21   : > { %593 = vsyncadd (%p680_p1), [#allocation3], 4294967232  ;;  %s749_s25 = sand.u32 1, %s608_s10  }
  0x22   : > { %s387_s26 = sshll.u32 %s749_s25, 3  ;;  %s170_s28 = scalar_lea.sflag [#allocation6], %s749_s25 }
  0x23   : > { %s173_s29 = scalar_lea.vmem [#allocation5], %s387_s26 }
  0x24   : > { %595 = dma.done.wait (%p690_p4), %s170_s28, 128  }
  0x25   : > { %597 = vsyncadd (%p690_p4), %s170_s28, 4294967168  ;;  %v627_v0 = vmov 0   ;;  %v628_v1 = vmov 2   ;;  %v197_v2 = vld [vmem:[#allocation2] sm:$0xf]  ;;  %v629_v3 = vmov 1  }
  0x26   : > { %473 = vset.pattern.permute.xlu0 %v627_v0  ;;  %475 = vset.pattern.permute.xlu1 %v628_v1  ;;  %v630_v4 = vmov 3   ;;  %v198_v5 = vld [vmem:[%s173_s29] sm:$0xff]  ;;  %s395_s17 = sshll.u32 %s616_s12, 3  ;;  %s194_s4 = scalar_lea.vmem [#allocation7], %s387_s26  ;;  %vm258_vm0 = vcmask 1043456  }
  0x27   : > { %201 = vperm.xlu0 %473, %v197_v2   ;;  %228 = vperm.xlu1 %475, %v197_v2   ;;  %v205_v8 = vperm.slane %v198_v5, 0  ;;  %v206_v9 = vperm.slane %v198_v5, 4  ;;  %v217_v10 = vperm.slane %v198_v5, 1  ;;  %v218_v11 = vperm.slane %v198_v5, 5  ;;  %s276_s3 = scalar_lea.hbm %s801_s2, %s395_s17  ;;  %s278_s5 = sshll.u32 %s194_s4, 4  ;;  %s279_s5 = int_to_ptr.vmem [resolvable:$true] %s278_s5 }
  0x28   : > { %v231_v12 = vperm.slane %v198_v5, 2  ;;  %v232_v13 = vperm.slane %v198_v5, 6  ;;  %v246_v14 = vperm.slane %v198_v5, 7  ;;  %v245_v15 = vperm.slane %v198_v5, 3  ;;  %s280_s7 = sshll.u32 %s276_s3, 4  ;;  %s263_s12 = scalar_lea.sflag [#allocation4], %s749_s25  ;;  %s281_s7 = int_to_ptr.hbm [resolvable:$true] %s280_s7 }
  0x29   : > { %v209_v16 = vperm.slane %v205_v8, 0  ;;  %v210_v17 = vperm.slane %v206_v9, 0  ;;  %v221_v18 = vperm.slane %v217_v10, 1  ;;  %v222_v19 = vperm.slane %v218_v11, 1  ;;  %s552_s8 = sshra.s32 %s281_s7, 4  ;;  %s558_s22 = scalar_lea.hbm %s801_s2, 16  ;;  %s553_s8 = int_to_ptr.hbm [resolvable:$true] %s552_s8 }
  0x2a   : > { %v235_v20 = vperm.slane %v231_v12, 2  ;;  %v236_v21 = vperm.slane %v232_v13, 2  ;;  %v250_v22 = vperm.slane %v246_v14, 3  ;;  %v249_v24 = vperm.slane %v245_v15, 3  ;;  %s554_s15 = scalar_lea.hbm %s553_s8, 8  ;;  %p559_p11 = scmp.lt.s32.totalorder %s553_s8, %s801_s2 }
  0x2b   : > { %p555_p1 = scmp.ne.s32.totalorder %s553_s8, %s554_s15  ;;  %p560_p12 = scmp.lt.s32.totalorder %s558_s22, %s554_s15 }
  0x2d   : > { %p556_p4 = pnand %p555_p1, %p725_p5  ;;  %p561_p13 = por %p560_p12, %p559_p11 }
  0x2f   : > { %474 = vset.pattern.permute.xlu0 %v629_v3  ;;  %476 = vset.pattern.permute.xlu1 %v630_v4  ;;  %p557_p8 = pneg %p556_p4 }
  0x30   : > { %214 = vperm.xlu0 %474, %v197_v2   ;;  %242 = vperm.xlu1 %476, %v197_v2  }
  0x31   : > { %p562_p0 = pnand %p561_p13, %p557_p8 }
  0x38   : > { %477 = vset.pattern.permute.xlu0 %v630_v4 }
  0x99   : > { %v202_v6 = vpop.permute.xlu0 %201  ;;  %v229_v7 = vpop.permute.xlu1 %228 }
  0x9a   : > { %v211_v26 = vmul.f32 %v209_v16, %v202_v6  ;;  %v212_v27 = vmul.f32 %v210_v17, %v202_v6  ;;  %v237_v30 = vmul.f32 %v235_v20, %v229_v7  ;;  %v238_v31 = vmul.f32 %v236_v21, %v229_v7 }
  0xa2   : > { %v215_v23 = vpop.permute.xlu0 %214  ;;  %v243_v25 = vpop.permute.xlu1 %242 }
  0xa3   : > { %v223_v28 = vmul.f32 %v221_v18, %v215_v23  ;;  %v224_v29 = vmul.f32 %v222_v19, %v215_v23  ;;  %v252_v34 = vmul.f32 %v250_v22, %v243_v25  ;;  %v251_v37 = vmul.f32 %v249_v24, %v243_v25 }
  0xa5   : > { %v225_v32 = vadd.f32 %v223_v28, %v211_v26  ;;  %v226_v33 = vadd.f32 %v224_v29, %v212_v27 }
  0xa7   : > { %v239_v35 = vadd.f32 %v237_v30, %v225_v32  ;;  %v240_v36 = vadd.f32 %v238_v31, %v226_v33 }
  0xa9   : > { %v254_v38 = vadd.f32 %v252_v34, %v240_v36  ;;  %v253_v39 = vadd.f32 %v251_v37, %v239_v35 }
  0xab   : > { %v257_v40 = vrot.slane %v254_v38, 4 }
  0xad   : > { %v259_v41 = vsel %vm258_vm0, %v253_v39, %v257_v40 }
  0xae   : > { %261 = vst [vmem:[%s194_s4] sm:$0xff] %v259_v41 }
  0xaf   : > { %565 = shalt.err (!%p562_p0)
}
  0xb0   : > { %402 = dma.vmem_to_hbm [thread:$0]  (%p725_p5), %s279_s5, 128, %s281_s7, %s263_s12  }
  0xb1 PF: > { %s292_s25 = sand.u32 1, %s604_s9   ;;  %p413_p3 = pnand %p381_p9, %p695_p6 }
  0xb2   : > { %s293_s26 = scalar_lea.sflag [#allocation4], %s292_s25 }
  0xb3   : > { %p414_p7 = pneg %p413_p3 }
  0xb5   : > { %599 = dma.done.wait (%p414_p7), %s293_s26, 128  }
  0xb6   : > { %601 = vsyncadd (%p414_p7), %s293_s26, 4294967168  ;;  %s19_s14 = sadd.s32 1, %s624_s14   ;;  %s809_s9 = smov %s608_s10 }
  0xb7   : > { %p16_p10 = scmp.ge.s32.totalorder %s19_s14, 4   ;;  %s810_s10 = smov %s612_s11 }
  0xb8   : > { %s811_s11 = smov %s734_s6  ;;  %s812_s12 = smov %s620_s13 }
  0xb9   : > { %s813_s13 = smov %s815_s27  ;;  %18 = sbr.rel (!%p16_p10) target bundleno = 7 (0x7), region = 78 }
  0xbe   :  { %299 = vsyncpa [#allocation3], 1 }
  0xbf   :  { %301 = vsyncpa [#allocation3 + $0x1], 1 }
  0xc0   :  { %302 = vsyncpa [#allocation6], 1 }
  0xc1   :  { %304 = vsyncpa [#allocation6 + $0x1], 1 }
  0xc2   :  { %305 = vsyncpa [#allocation4], 1 }
  0xc3   :  { %307 = vsyncpa [#allocation4 + $0x1], 1 }

</bundles_post_ra>
